<compile_context>
chip_gen: v7x
topology: tpu7x:2x2x1
jax: 0.10.0
libtpu: 0.0.40
codegen_flags: <defaults>
</compile_context>

<pallas_src>
import functools

import jax
import jax.numpy as jnp
from jax.experimental import pallas as pl
from jax.experimental.pallas import tpu as pltpu


def _round_up(x, m):
    return (x + m - 1) // m * m


def plugts_kernel(x_user_ref, item_ref, WwP_ref, HwPb_ref, W2T_ref, b2_ref,
                  Mh_ref, base_ref, out_ref):
    tb = x_user_ref.shape[0]
    NI = HwPb_ref.shape[0]

    # In-kernel item "gather": one-hot(item) @ (Hw.T @ W1_item.T + b1).
    items = item_ref[...]                                        # (tb, 1) int32
    iota = jax.lax.broadcasted_iota(jnp.int32, (tb, NI), 1)
    onehot = (items == iota).astype(jnp.float32)                 # (tb, NI)
    vb = jnp.dot(onehot, HwPb_ref[...],
                 preferred_element_type=jnp.float32)             # (tb, 16)

    # h1 = relu(x_user @ WwP + vb)      (embeddings + linear_1 fused)
    h1 = jnp.dot(x_user_ref[...], WwP_ref[...],
                 preferred_element_type=jnp.float32) + vb
    h1 = jnp.maximum(h1, 0.0)                                    # (tb, 16)

    # h2 = relu(linear_2(h1))
    h2 = jnp.dot(h1, W2T_ref[...],
                 preferred_element_type=jnp.float32) + b2_ref[...]
    h2 = jnp.maximum(h2, 0.0)                                    # (tb, 8)

    # Fused head: col 0 = linear_3(cat([h2, 1])); cols 1-8 = h2; col 9 = 1.0.
    out_ref[...] = (jnp.dot(h2, Mh_ref[...],
                            preferred_element_type=jnp.float32) + base_ref[...])


@functools.partial(jax.jit, static_argnames=("tile_b",))
def plugts_forward(x_user, x_item, params, tile_b=1024):
    """Returns (out [B,1], h2_cat [B,9]) — same as PlugTS.forward."""
    assert tile_b > 0 and tile_b % 8 == 0, "tile_b must be a positive multiple of 8"
    B, NU = x_user.shape
    Ww, Hw, W1, b1, W2, b2, W3 = (params[k] for k in
                                  ("Ww", "Hw", "W1", "b1", "W2", "b2", "W3"))
    EK = Ww.shape[0]
    NI = Hw.shape[1]

    # ---- host-side weight fusion (exact algebraic rewrite, f32) ----
    WwP = (Ww.T @ W1[:, :EK].T).astype(jnp.bfloat16)   # (NU, 16), bf16 stream
    HwPb = Hw.T @ W1[:, EK:].T + b1[None, :]           # (NI, 16), b1 folded, f32
    W2T = W2.T                                         # (16, 8)
    b2r = b2.reshape(1, 8)

    # Head matrix folding linear_3 + identity copy of h2 + constant ones column.
    Mh = jnp.zeros((8, 16), jnp.float32)
    Mh = Mh.at[:, 0].set(W3[0, :8])
    Mh = Mh.at[:, 1:9].set(jnp.eye(8, dtype=jnp.float32))
    base = jnp.zeros((1, 16), jnp.float32)
    base = base.at[0, 0].set(W3[0, 8])                 # weight on the ones column
    base = base.at[0, 9].set(1.0)                      # the ones column itself

    # ---- inputs: bf16 features (exact for the binary Yahoo!R6B features) ----
    x_user_bf = x_user if x_user.dtype == jnp.bfloat16 else x_user.astype(jnp.bfloat16)
    x_item2 = x_item.astype(jnp.int32).reshape(B, 1)

    # ---- batch tiling: no host-side padding; trailing block is clipped by Pallas.
    # Shrink the tile for small/medium B so the grid has >= 2 parallel steps
    # (keeps both v7x TensorCores busy); cap at 2048 for v5e's 16 MiB scoped VMEM.
    tb = min(tile_b, 2048, max(8, _round_up(pl.cdiv(B, 2), 8)))
    grid = (pl.cdiv(B, tb),)

    batch_spec = lambda shape: pl.BlockSpec(shape, lambda i: (i, 0))
    const_spec = lambda shape: pl.BlockSpec(shape, lambda i: (0, 0))

    slab = pl.pallas_call(
        plugts_kernel,
        out_shape=jax.ShapeDtypeStruct((B, 16), jnp.float32),
        grid=grid,
        in_specs=[
            batch_spec((tb, NU)),    # x_user (bf16, streamed)
            batch_spec((tb, 1)),     # x_item (int32, streamed, 4 B/row)
            const_spec((NU, 16)),    # WwP  (resident, bf16)
            const_spec((NI, 16)),    # HwPb (resident item table + b1, f32)
            const_spec((16, 8)),     # W2T
            const_spec((1, 8)),      # b2
            const_spec((8, 16)),     # Mh (fused head)
            const_spec((1, 16)),     # base
        ],
        out_specs=batch_spec((tb, 16)),
        compiler_params=pltpu.CompilerParams(
            dimension_semantics=("parallel",)),
    )(x_user_bf, x_item2, WwP, HwPb, W2T, b2r, Mh, base)

    # TODO(synk): if the consumer can take the packed (B,16) slab, skip this split.
    out = slab[:, 0:1]
    h2_cat = slab[:, 1:10]
    return out, h2_cat


def ref_forward(x_user, x_item, params):
    """Plain-JAX f32 reference replicating the PyTorch forward."""
    Ww, Hw, W1, b1, W2, b2, W3 = (params[k] for k in
                                  ("Ww", "Hw", "W1", "b1", "W2", "b2", "W3"))
    NI = Hw.shape[1]
    xu = x_user.astype(jnp.float32)
    u_emb = xu @ Ww.T
    v_emb = jax.nn.one_hot(x_item, NI, dtype=jnp.float32) @ Hw.T
    z = jnp.concatenate([u_emb, v_emb], axis=1)
    h1 = jax.nn.relu(z @ W1.T + b1)
    h2 = jax.nn.relu(h1 @ W2.T + b2)
    h2c = jnp.concatenate([h2, jnp.ones((h2.shape[0], 1), jnp.float32)], axis=1)
    out = h2c @ W3.T
    return out, h2c


def init_params(key, num_users, num_items, embedding_k=6):
    """Deterministic synthetic weights (shapes match the PyTorch module)."""
    ks = jax.random.split(key, 7)
    scale = 0.1
    return {
        "Ww": scale * jax.random.normal(ks[0], (embedding_k, num_users), jnp.float32),
        "Hw": scale * jax.random.normal(ks[1], (embedding_k, num_items), jnp.float32),
        "W1": scale * jax.random.normal(ks[2], (16, 2 * embedding_k), jnp.float32),
        "b1": scale * jax.random.normal(ks[3], (16,), jnp.float32),
        "W2": scale * jax.random.normal(ks[4], (8, 16), jnp.float32),
        "b2": scale * jax.random.normal(ks[5], (8,), jnp.float32),
        "W3": scale * jax.random.normal(ks[6], (1, 9), jnp.float32),
    }


if __name__ == "__main__":
    # Yahoo!R6B-like shapes: 136 binary user features, 50 items.
    NUM_USERS, NUM_ITEMS, EK = 136, 50, 6
    B = 200   # not a multiple of the tile: exercises the clipped trailing block

    key = jax.random.PRNGKey(0)
    kp, ku, ki = jax.random.split(key, 3)

    params = init_params(kp, NUM_USERS, NUM_ITEMS, EK)
    # Binary user features stored directly in bf16 (cast is exact for {0,1}).
    x_user = jax.random.bernoulli(ku, 0.5, (B, NUM_USERS)).astype(jnp.bfloat16)
    x_item = jax.random.randint(ki, (B,), 0, NUM_ITEMS, jnp.int32)

    out, h2_cat = plugts_forward(x_user, x_item, params)   # default tile_b=1024
    out = jax.block_until_ready(out)
    h2_cat = jax.block_until_ready(h2_cat)

    out_ref, h2_ref = ref_forward(x_user, x_item, params)
    assert out.shape == (B, 1) and h2_cat.shape == (B, 9)
    # bf16 feature/weight stream -> relaxed tolerance vs the pure-f32 reference.
    assert jnp.allclose(out, out_ref, atol=2e-2, rtol=2e-2), \
        float(jnp.max(jnp.abs(out - out_ref)))
    assert jnp.allclose(h2_cat, h2_ref, atol=2e-2, rtol=2e-2), \
        float(jnp.max(jnp.abs(h2_cat - h2_ref)))

    print("KERNEL_OK")
</pallas_src>

<mosaic_0001>
module attributes {stable_mosaic.version = 11 : i64} {
  func.func @plugts_kernel(%arg0: i32, %arg1: memref<104x136xbf16, #tpu.memory_space<vmem>>, %arg2: memref<104x1xi32, #tpu.memory_space<vmem>>, %arg3: memref<136x16xbf16, #tpu.memory_space<vmem>>, %arg4: memref<50x16xf32, #tpu.memory_space<vmem>>, %arg5: memref<16x8xf32, #tpu.memory_space<vmem>>, %arg6: memref<1x8xf32, #tpu.memory_space<vmem>>, %arg7: memref<8x16xf32, #tpu.memory_space<vmem>>, %arg8: memref<1x16xf32, #tpu.memory_space<vmem>>, %arg9: memref<104x16xf32, #tpu.memory_space<vmem>>) attributes {dimension_semantics = [#tpu.dimension_semantics<parallel>], iteration_bounds = array<i64: 2>, scalar_prefetch = 0 : i64, scratch_operands = 0 : i64, tpu.core_type = #tpu.core_type<tc>, window_params = [{transform_indices = @transform_0, window_bounds = array<i64: 104, 136>}, {transform_indices = @transform_1, window_bounds = array<i64: 104, 1>}, {pipeline_mode = #tpu.pipeline_mode<synchronous>, transform_indices = @transform_2, window_bounds = array<i64: 136, 16>}, {pipeline_mode = #tpu.pipeline_mode<synchronous>, transform_indices = @transform_3, window_bounds = array<i64: 50, 16>}, {pipeline_mode = #tpu.pipeline_mode<synchronous>, transform_indices = @transform_4, window_bounds = array<i64: 16, 8>}, {pipeline_mode = #tpu.pipeline_mode<synchronous>, transform_indices = @transform_5, window_bounds = array<i64: 1, 8>}, {pipeline_mode = #tpu.pipeline_mode<synchronous>, transform_indices = @transform_6, window_bounds = array<i64: 8, 16>}, {pipeline_mode = #tpu.pipeline_mode<synchronous>, transform_indices = @transform_7, window_bounds = array<i64: 1, 16>}, {transform_indices = @transform_8, window_bounds = array<i64: 104, 16>}]} {
    %c0 = arith.constant 0 : index
    %c0_0 = arith.constant 0 : index
    %0 = vector.load %arg2[%c0, %c0_0] : memref<104x1xi32, #tpu.memory_space<vmem>>, vector<104x1xi32>
    %1 = tpu.iota {dimensions = array<i32: 1>} : vector<104x50xi32>
    %2 = vector.broadcast %0 : vector<104x1xi32> to vector<104x50xi32>
    %3 = arith.cmpi eq, %2, %1 : vector<104x50xi32>
    %4 = arith.extui %3 : vector<104x50xi1> to vector<104x50xi32>
    %5 = arith.sitofp %4 : vector<104x50xi32> to vector<104x50xf32>
    %c0_1 = arith.constant 0 : index
    %c0_2 = arith.constant 0 : index
    %6 = vector.load %arg4[%c0_1, %c0_2] : memref<50x16xf32, #tpu.memory_space<vmem>>, vector<50x16xf32>
    %cst = arith.constant dense<0.000000e+00> : vector<104x16xf32>
    %7 = tpu.matmul %5, %6, %cst {dimension_numbers = #tpu.dot_dimension_numbers<[1], [0], [0], [1], [0, 0, 1, 1], [], []>} : vector<104x50xf32>, vector<50x16xf32>, vector<104x16xf32> -> vector<104x16xf32>
    %c0_3 = arith.constant 0 : index
    %c0_4 = arith.constant 0 : index
    %8 = vector.load %arg1[%c0_3, %c0_4] : memref<104x136xbf16, #tpu.memory_space<vmem>>, vector<104x136xbf16>
    %c0_5 = arith.constant 0 : index
    %c0_6 = arith.constant 0 : index
    %9 = vector.load %arg3[%c0_5, %c0_6] : memref<136x16xbf16, #tpu.memory_space<vmem>>, vector<136x16xbf16>
    %cst_7 = arith.constant dense<0.000000e+00> : vector<104x16xf32>
    %10 = tpu.matmul %8, %9, %cst_7 {dimension_numbers = #tpu.dot_dimension_numbers<[1], [0], [0], [1], [0, 0, 1, 1], [], []>} : vector<104x136xbf16>, vector<136x16xbf16>, vector<104x16xf32> -> vector<104x16xf32>
    %11 = arith.addf %10, %7 : vector<104x16xf32>
    %cst_8 = arith.constant 0.000000e+00 : f32
    %12 = vector.broadcast %cst_8 : f32 to vector<104x16xf32>
    %13 = arith.maximumf %11, %12 : vector<104x16xf32>
    %c0_9 = arith.constant 0 : index
    %c0_10 = arith.constant 0 : index
    %14 = vector.load %arg5[%c0_9, %c0_10] : memref<16x8xf32, #tpu.memory_space<vmem>>, vector<16x8xf32>
    %cst_11 = arith.constant dense<0.000000e+00> : vector<104x8xf32>
    %15 = tpu.matmul %13, %14, %cst_11 {dimension_numbers = #tpu.dot_dimension_numbers<[1], [0], [0], [1], [0, 0, 1, 1], [], []>} : vector<104x16xf32>, vector<16x8xf32>, vector<104x8xf32> -> vector<104x8xf32>
    %c0_12 = arith.constant 0 : index
    %c0_13 = arith.constant 0 : index
    %16 = vector.load %arg6[%c0_12, %c0_13] : memref<1x8xf32, #tpu.memory_space<vmem>>, vector<1x8xf32>
    %17 = vector.broadcast %16 : vector<1x8xf32> to vector<104x8xf32>
    %18 = arith.addf %15, %17 : vector<104x8xf32>
    %cst_14 = arith.constant 0.000000e+00 : f32
    %19 = vector.broadcast %cst_14 : f32 to vector<104x8xf32>
    %20 = arith.maximumf %18, %19 : vector<104x8xf32>
    %c0_15 = arith.constant 0 : index
    %c0_16 = arith.constant 0 : index
    %21 = vector.load %arg7[%c0_15, %c0_16] : memref<8x16xf32, #tpu.memory_space<vmem>>, vector<8x16xf32>
    %cst_17 = arith.constant dense<0.000000e+00> : vector<104x16xf32>
    %22 = tpu.matmul %20, %21, %cst_17 {dimension_numbers = #tpu.dot_dimension_numbers<[1], [0], [0], [1], [0, 0, 1, 1], [], []>} : vector<104x8xf32>, vector<8x16xf32>, vector<104x16xf32> -> vector<104x16xf32>
    %c0_18 = arith.constant 0 : index
    %c0_19 = arith.constant 0 : index
    %23 = vector.load %arg8[%c0_18, %c0_19] : memref<1x16xf32, #tpu.memory_space<vmem>>, vector<1x16xf32>
    %24 = vector.broadcast %23 : vector<1x16xf32> to vector<104x16xf32>
    %25 = arith.addf %22, %24 : vector<104x16xf32>
    %c0_20 = arith.constant 0 : index
    %c0_21 = arith.constant 0 : index
    %26 = vector.load %arg9[%c0_20, %c0_21] : memref<104x16xf32, #tpu.memory_space<vmem>>, vector<104x16xf32>
    tpu.vector_store %arg9[%c0_20, %c0_21], %25 {strides = array<i32>} : memref<104x16xf32, #tpu.memory_space<vmem>>, vector<104x16xf32>,
    return
  }
  func.func @transform_0(%arg0: i32) -> (i32, i32) {
    %c0_i32 = arith.constant 0 : i32
    %c0_i32_0 = arith.constant 0 : i32
    return %arg0, %c0_i32 : i32, i32
  }
  func.func @transform_1(%arg0: i32) -> (i32, i32) {
    %c0_i32 = arith.constant 0 : i32
    %c0_i32_0 = arith.constant 0 : i32
    return %arg0, %c0_i32 : i32, i32
  }
  func.func @transform_2(%arg0: i32) -> (i32, i32) {
    %c0_i32 = arith.constant 0 : i32
    %c0_i32_0 = arith.constant 0 : i32
    %c0_i32_1 = arith.constant 0 : i32
    return %c0_i32, %c0_i32_0 : i32, i32
  }
  func.func @transform_3(%arg0: i32) -> (i32, i32) {
    %c0_i32 = arith.constant 0 : i32
    %c0_i32_0 = arith.constant 0 : i32
    %c0_i32_1 = arith.constant 0 : i32
    return %c0_i32, %c0_i32_0 : i32, i32
  }
  func.func @transform_4(%arg0: i32) -> (i32, i32) {
    %c0_i32 = arith.constant 0 : i32
    %c0_i32_0 = arith.constant 0 : i32
    %c0_i32_1 = arith.constant 0 : i32
    return %c0_i32, %c0_i32_0 : i32, i32
  }
  func.func @transform_5(%arg0: i32) -> (i32, i32) {
    %c0_i32 = arith.constant 0 : i32
    %c0_i32_0 = arith.constant 0 : i32
    %c0_i32_1 = arith.constant 0 : i32
    return %c0_i32, %c0_i32_0 : i32, i32
  }
  func.func @transform_6(%arg0: i32) -> (i32, i32) {
    %c0_i32 = arith.constant 0 : i32
    %c0_i32_0 = arith.constant 0 : i32
    %c0_i32_1 = arith.constant 0 : i32
    return %c0_i32, %c0_i32_0 : i32, i32
  }
  func.func @transform_7(%arg0: i32) -> (i32, i32) {
    %c0_i32 = arith.constant 0 : i32
    %c0_i32_0 = arith.constant 0 : i32
    %c0_i32_1 = arith.constant 0 : i32
    return %c0_i32, %c0_i32_0 : i32, i32
  }
  func.func @transform_8(%arg0: i32) -> (i32, i32) {
    %c0_i32 = arith.constant 0 : i32
    %c0_i32_0 = arith.constant 0 : i32
    return %arg0, %c0_i32 : i32, i32
  }
}

</mosaic_0001>

<bundles_post_ra>
// kernel: plugts_forward.1
= control target key start
LH: loop header
LB: loop body
LE: loop exit
PB: predicated region body
PF: predicated region fallthrough
CT: control target
= control target key end

     0   :  { %s2151_s27 = smov 0   ;;  %s2153_s28 = smov 0   ;;  %s2602_s0 = inlined_call_operand.vmem [shape: bf16[200,136], index: 0, kind: input, shape index: {}]   ;;  %s2603_s1 = inlined_call_operand.vmem [shape: s32[200,1], index: 1, kind: input, shape index: {}]   ;;  %s2604_s2 = inlined_call_operand.vmem [shape: bf16[136,16], index: 2, kind: input, shape index: {}]   ;;  %s2605_s3 = inlined_call_operand.vmem [shape: f32[50,16], index: 3, kind: input, shape index: {}]   ;;  %s2606_s4 = inlined_call_operand.vmem [shape: f32[16,8], index: 4, kind: input, shape index: {}]   ;;  %s2607_s5 = inlined_call_operand.vmem [shape: f32[1,8], index: 5, kind: input, shape index: {}]   ;;  %s2608_s6 = inlined_call_operand.vmem [shape: f32[8,16], index: 6, kind: input, shape index: {}]   ;;  %s2609_s7 = inlined_call_operand.vmem [shape: f32[1,16], index: 7, kind: input, shape index: {}]   ;;  %s2610_s8 = inlined_call_operand.vmem [shape: f32[200,16], index: 8, kind: output, shape index: {}]  }
   0x1   :  { %s2155_s29 = smov 0  }
   0x2 LB: > { %s2164_s30 = sadd.s32 4294967295, %s2068_s29   ;;  %s2166_s9 = sadd.s32 1, %s2068_s29   ;;  %s2068_s29 = sphi %s2155_s29, %s2617_s29   ;;  %s2064_s28 = sphi %s2153_s28, %s2616_s28   ;;  %s2060_s27 = sphi %s2151_s27, %s2615_s27  }
   0x3   : > { %s200_s10 = ssub.s32 %s2068_s29, %s2166_s9  ;;  %s203_s11 = sadd.s32 1, %s2064_s28 }
   0x4   : > { %p201_p0 = scmp.eq.s32.totalorder %s200_s10, 0  ;;  %p213_p1 = scmp.ne.s32.totalorder %s2064_s28, %s2060_s27 }
   0x5   : > { %p214_p2 = scmp.eq.s32.totalorder %s2164_s30, 1  ;;  %p1582_p3 = scmp.ge.s32.totalorder %s2068_s29, 1 }
   0x6   : > { %s2174_s12 = scalar_select %p201_p0, %s2064_s28, %s203_s11  }
   0x7   : > { %p2176_p4 = por %p214_p2, %p213_p1  ;;  %p293_p5 = scmp.lt.s32.totalorder %s2068_s29, 3 }
   0x9   : > { %p294_p6 = pnand %p1582_p3, %p293_p5 }
   0xa   : > { %s2181_s14 = smul.u32 (!%p294_p6), 13, %s2164_s30  ;;  %v2102_v0 = vmov (!%p294_p6), 0   ;;  %v1981_v1 = vld [vmem:[%s2604_s2] sm:$0xff] (!%p294_p6)   ;;  %v2103_v2 = vmov (!%p294_p6), 0.0|0.0   ;;  %v1982_v3 = vld [vmem:[%s2604_s2 + $0x8] sm:$0xff] (!%p294_p6)   ;;  %v1983_v4 = vld [vmem:[%s2604_s2 + $0x10] sm:$0xff] (!%p294_p6)   ;;  %v391_v51 = vlaneseq (!%p294_p6) }
   0xb   : > { %297 = sbr.rel (%p294_p6) target bundleno = 909 (0x38d), region = 52  ;;  %1980 = vset.pattern.permute.xlu1 (!%p294_p6), %v2102_v0  ;;  %1979 = vset.pattern.permute.xlu0 (!%p294_p6), %v2102_v0  ;;  %v471_v5 = vld [vmem:[%s2605_s3] sm:$0xff] (!%p294_p6)  ;;  %v472_v6 = vld [vmem:[%s2605_s3 + $0x8] sm:$0xff] (!%p294_p6)  ;;  %vm2104_vm0 = vmmov (!%p294_p6), 0   ;;  %v2105_v12 = vmov (!%p294_p6), 0.0   ;;  %v1984_v13 = vld [vmem:[%s2604_s2 + $0x18] sm:$0xff] (!%p294_p6)  }
   0xc   : > { %p347_p7 = scmp.lt.s32.totalorder (!%p294_p6), %s2181_s14, 24  ;;  %819 = vmatprep.subr.bf16.mxu1 (!%p294_p6), %v2102_v0  ;;  %1871 = vmatprep.subr.bf16.mxu0 (!%p294_p6), %v2103_v2  ;;  %v1872_v9 = vpack.c.bf16 (!%p294_p6), %v472_v6, %v471_v5  ;;  %v1985_v15 = vld [vmem:[%s2604_s2 + $0x20] sm:$0xff] (!%p294_p6)   ;;  %v473_v16 = vld [vmem:[%s2605_s3 + $0x10] sm:$0xff] (!%p294_p6)  ;;  %v474_v17 = vld [vmem:[%s2605_s3 + $0x18] sm:$0xff] (!%p294_p6)  ;;  %vm793_vm1 = vcmask (!%p294_p6), 64512   ;;  %vm518_vm2 = vcmask (!%p294_p6), 1041408  }
   0xd   : > { %820 = vmatpush1.bf16.msra.mxu1 (!%p294_p6), %v1981_v1  ;;  %1748 = vmatprep.mubr.msk.f32.mxu0 (!%p294_p6), %vm2104_vm0, %v2105_v12  ;;  %v1875_v19 = vpack.c.bf16 (!%p294_p6), %v474_v17, %v473_v16  ;;  %v475_v20 = vld [vmem:[%s2605_s3 + $0x20] sm:$0xff] (!%p294_p6)  ;;  %v476_v21 = vld [vmem:[%s2605_s3 + $0x28] sm:$0xff] (!%p294_p6)  ;;  %v477_v27 = vld [vmem:[%s2605_s3 + $0x30] sm:$0x3] (!%p294_p6)  ;;  %vm815_vm3 = vcmask (!%p294_p6), 1043456   ;;  %v2300_v52 = vand.u32 (!%p294_p6), 127, %v391_v51 }
   0xe   : > { %821 = vmatprep.subr.bf16.mxu1 (!%p294_p6), %v2102_v0  ;;  %1873 = vmatpush3.bf16.msra.mxu0 (!%p294_p6), %v1872_v9  ;;  %v1878_v22 = vpack.c.bf16 (!%p294_p6), %v476_v21, %v475_v20  ;;  %v1986_v25 = vld [vmem:[%s2604_s2 + $0x28] sm:$0xff] (!%p294_p6)   ;;  %v1987_v30 = vld [vmem:[%s2604_s2 + $0x30] sm:$0xff] (!%p294_p6)   ;;  %v1988_v33 = vld [vmem:[%s2604_s2 + $0x38] sm:$0xff] (!%p294_p6)   ;;  %vm478_vm4 = vcmask (!%p294_p6), 408576  }
   0xf   : > { %1874 = vmatprep.subr.bf16.mxu0 (!%p294_p6), %v2103_v2  ;;  %v1989_v34 = vld [vmem:[%s2604_s2 + $0x40] ss:$0 sps:$4 sm:$0xff] (!%p294_p6)   ;;  %v921_v54 = vld [vmem:[%s2606_s4 + $0x8] sm:$0xff] (!%p294_p6) }
  0x10   : > { %v817_v36 = vsel (!%p294_p6), %vm815_vm3, %v1989_v34, 0  ;;  %v920_v53 = vld [vmem:[%s2606_s4] sm:$0xff] (!%p294_p6) }
  0x11   : > { %822 = vmatpush1.bf16.msra.mxu1 (!%p294_p6), %v1982_v3  ;;  %v1881_v56 = vpack.c.bf16 (!%p294_p6), %v921_v54, %v920_v53  ;;  %v1112_v34 = vld [vmem:[%s2608_s6] sm:$0xff] (!%p294_p6) }
  0x12   : > { %s2195_s19 = scalar_select %p347_p7, %s2181_s14, 24  ;;  %823 = vmatprep.subr.bf16.mxu1 %v2102_v0  ;;  %1876 = vmatpush3.bf16.msra.mxu0 %v1875_v19 }
  0x13   : > { %1877 = vmatprep.subr.bf16.mxu0 %v2103_v2  ;;  %s1684_s26 = smul.u32 (%p2176_p4), 104, %s2164_s30 }
  0x14   : > { %s1683_s20 = sshll.u32 %s2195_s19, 3  ;;  %s338_s19 = sand.u32 1, %s2060_s27  }
  0x15   : > { %s2202_s23 = scalar_lea.vmem %s2603_s1, %s1683_s20  ;;  %824 = vmatpush1.bf16.msra.mxu1 %v1983_v4  ;;  %s2238_s29 = scalar_lea.vmem %s2602_s0, %s1683_s20 }
  0x16   : > { %v380_v7 = vld [vmem:[%s2202_s23 + $0x10] sm:$0xff]  ;;  %v378_v8 = vld [vmem:[%s2202_s23] sm:$0xff]  ;;  %v381_v10 = vld [vmem:[%s2202_s23 + $0x18] sm:$0xff]  ;;  %825 = vmatprep.subr.bf16.mxu1 %v2102_v0  ;;  %1879 = vmatpush3.bf16.msra.mxu0 %v1878_v22  ;;  %s1885_s21 = smul.u32 104, %s338_s19  ;;  %s1310_s27 = ssub.s32 (%p2176_p4), 25, %s2181_s14 }
  0x17   : > { %400 = vperm.xlu1 %1980, %v380_v7   ;;  %394 = vperm.xlu0 %1979, %v378_v8   ;;  %v379_v11 = vld [vmem:[%s2202_s23 + $0x8] sm:$0xff]  ;;  %v382_v18 = vld [vmem:[%s2202_s23 + $0x20] sm:$0xff]  ;;  %v385_v24 = vld [vmem:[%s2202_s23 + $0x38] sm:$0xff]  ;;  %p1311_p8 = scmp.lt.s32.totalorder (%p2176_p4), %s1310_s27, 13  ;;  %s2520_s11 = scalar_lea.vmem (%p2176_p4), %s2610_s8, %s1684_s26  }
  0x18   : > { %v383_v14 = vld [vmem:[%s2202_s23 + $0x28] sm:$0xff]  ;;  %v384_v26 = vld [vmem:[%s2202_s23 + $0x30] sm:$0xff]  ;;  %v386_v29 = vld [vmem:[%s2202_s23 + $0x40] sm:$0xff]  ;;  %1746 = vmatprep.subr.mxu0 %v2105_v12  ;;  %s2485_s25 = scalar_lea.vmem [#allocation2], %s1885_s21  }
  0x19   : > { %826 = vmatpush1.bf16.msra.mxu1 %v1984_v13  ;;  %v1992_v23 = vld [vmem:[%s2238_s29 + $0x4] ss:$8 sps:$4 sm:$0xff]   ;;  %v389_v31 = vld [vmem:[%s2202_s23 + $0x58] sm:$0xff]  ;;  %v388_v32 = vld [vmem:[%s2202_s23 + $0x50] sm:$0xff] }
  0x1a   : > { %827 = vmatprep.subr.bf16.mxu1 %v2102_v0  ;;  %1636 = vmatprep.mubr.msk.bf16.mxu1 %vm793_vm1, %v1992_v23  ;;  %v387_v28 = vld [vmem:[%s2202_s23 + $0x48] sm:$0xff]  ;;  %v390_v35 = vld [vmem:[%s2202_s23 + $0x60] sm:$0xff]  ;;  %v1993_v38 = vld [vmem:[%s2238_s29 + $0x14] ss:$8 sps:$4 sm:$0xff]  }
  0x1b   : > { %403 = vperm.xlu1 %1980, %v381_v10   ;;  %397 = vperm.xlu0 %1979, %v379_v11   ;;  %v1990_v37 = vld [vmem:[%s2238_s29] ss:$8 sps:$4 sm:$0xff]   ;;  %v1995_v39 = vld [vmem:[%s2238_s29 + $0x10] ss:$8 sps:$4 sm:$0xff]   ;;  %v1996_v40 = vld [vmem:[%s2238_s29 + $0x24] ss:$8 sps:$4 sm:$0xff]  }
  0x1c   : > { %1747 = vmatpush3.msk.msra.mxu0 %vm518_vm2, %v477_v27  ;;  %v1998_v41 = vld [vmem:[%s2238_s29 + $0x20] ss:$8 sps:$4 sm:$0xff]   ;;  %v1999_v42 = vld [vmem:[%s2238_s29 + $0x34] ss:$8 sps:$4 sm:$0xff]   ;;  %v2001_v43 = vld [vmem:[%s2238_s29 + $0x30] ss:$8 sps:$4 sm:$0xff]  }
  0x1d   : > { %828 = vmatpush1.bf16.msra.mxu1 %v1985_v15  ;;  %1880 = vmatprep.subr.bf16.mxu0 %v2103_v2  ;;  %v2002_v44 = vld [vmem:[%s2238_s29 + $0x44] ss:$8 sps:$4 sm:$0xff]   ;;  %v2004_v45 = vld [vmem:[%s2238_s29 + $0x40] ss:$8 sps:$4 sm:$0xff]   ;;  %v2005_v46 = vld [vmem:[%s2238_s29 + $0x54] ss:$8 sps:$4 sm:$0xff]  }
  0x1e   : > { %829 = vmatprep.subr.bf16.mxu1 %v2102_v0  ;;  %v664_v47 = vld [vmem:[%s2238_s29 + $0x60] sm:$0xff]  ;;  %v2007_v48 = vld [vmem:[%s2238_s29 + $0x50] ss:$8 sps:$4 sm:$0xff]  }
  0x1f   : > { %409 = vperm.xlu1 %1980, %v383_v14   ;;  %406 = vperm.xlu0 %1979, %v382_v18   ;;  %v1626_v49 = vcombine.high %v664_v47, %v664_v47  ;;  %v1625_v50 = vcombine.low %v664_v47, %v664_v47 }
  0x21   : > { %830 = vmatpush1.bf16.msra.mxu1 %v1986_v25 }
  0x22   : > { %831 = vmatprep.subr.bf16.mxu1 %v2102_v0 }
  0x23   : > { %415 = vperm.xlu1 %1980, %v385_v24   ;;  %412 = vperm.xlu0 %1979, %v384_v26  }
  0x25   : > { %832 = vmatpush1.bf16.msra.mxu1 %v1987_v30 }
  0x26   : > { %833 = vmatprep.subr.bf16.mxu1 %v2102_v0 }
  0x27   : > { %421 = vperm.xlu1 %1980, %v387_v28   ;;  %418 = vperm.xlu0 %1979, %v386_v29  }
  0x29   : > { %834 = vmatpush1.bf16.msra.mxu1 %v1988_v33 }
  0x2a   : > { %835 = vmatprep.subr.bf16.mxu1 %v2102_v0 }
  0x2b   : > { %427 = vperm.xlu1 %1980, %v389_v31   ;;  %424 = vperm.xlu0 %1979, %v388_v32  }
  0x2d   : > { %836 = vmatpush1.bf16.msra.mxu1 %v817_v36 }
  0x2e   : > { %1883 = vmatprep.subr.mxu1 %v2105_v12 }
  0x2f   : > { %430 = vperm.xlu0 %1979, %v390_v35  }
  0x30   : > { %852 = vmatmul.mubr.bf16.vlgmr.msra.gmra.mrb[0].mxu1 %v1990_v37 }
  0x31   : > { %1637 = vmatprep.mubr.msk.bf16.mxu1 %vm793_vm1, %v1993_v38  ;;  %1884 = vmatpush3.msra.mxu1 %v1112_v34 }
  0x38   : > { %860 = vmatmul.mubr.bf16.gmra.mrb[4].mxu1 %v1995_v39 }
  0x39   : > { %1638 = vmatprep.mubr.msk.bf16.mxu1 %vm793_vm1, %v1996_v40 }
  0x40   : > { %868 = vmatmul.mubr.bf16.gmra.mrb[8].mxu1 %v1998_v41 }
  0x41   : > { %1639 = vmatprep.mubr.msk.bf16.mxu1 %vm793_vm1, %v1999_v42 }
  0x48   : > { %876 = vmatmul.mubr.bf16.gmra.mrb[12].mxu1 %v2001_v43 }
  0x49   : > { %1640 = vmatprep.mubr.msk.bf16.mxu1 %vm793_vm1, %v2002_v44 }
  0x50   : > { %884 = vmatmul.mubr.bf16.gmra.mrb[16].mxu1 %v2004_v45 }
  0x51   : > { %1641 = vmatprep.mubr.msk.bf16.mxu1 %vm793_vm1, %v2005_v46 }
  0x58   : > { %892 = vmatmul.mubr.bf16.gmra.mrb[20].mxu1 %v2007_v48 }
  0x59   : > { %1642 = vmatprep.mubr.msk.bf16.mxu1 %vm793_vm1, %v1626_v49 }
  0x60   : > { %900 = vmatmul.mubr.bf16.gmra.mrb[24].mxu1 %v1625_v50 }
  0x61   : > { %1841 = vmatprep.mubr.msk.f32.mxu1 %vm2104_vm0, %v2105_v12 }
  0x96   : > { %v395_v55 = vpop.permute.xlu0 %394  ;;  %v401_v58 = vpop.permute.xlu1 %400 }
  0x97   : > { %vm432_vm5 = vcmp.eq.s32.totalorder %v395_v55, %v2300_v52  ;;  %vm434_vm6 = vcmp.eq.s32.totalorder %v401_v58, %v2300_v52 }
  0x98   : > { %v1586_v57 = vsel %vm432_vm5, 1.0, %v2105_v12  ;;  %v1588_v61 = vsel %vm434_vm6, 1.0, %v2105_v12 }
  0x99   : > { %1749 = vmatmul.mubr.msk.f32.vlgmr.msra.gmra.mrb[0].mxu0 %vm478_vm4, %v1586_v57 }
  0x9a   : > { %v398_v59 = vpop.permute.xlu0 %397  ;;  %1751 = vmatprep.mubr.msk.f32.mxu0 %vm2104_vm0, %v2105_v12  ;;  %1882 = vmatpush3.bf16.msra.mxu0 %v1881_v56  ;;  %v404_v62 = vpop.permute.xlu1 %403 }
  0x9b   : > { %vm433_vm7 = vcmp.eq.s32.totalorder %v398_v59, %v2300_v52  ;;  %1830 = vmatprep.subr.mxu0 %v2105_v12  ;;  %vm435_vm8 = vcmp.eq.s32.totalorder %v404_v62, %v2300_v52 }
  0x9c   : > { %v1587_v60 = vsel %vm433_vm7, 1.0, %v2105_v12  ;;  %v1589_v0 = vsel %vm435_vm8, 1.0, %v2105_v12 }
  0x9d   : > { %1752 = vmatmul.mubr.msk.f32.gmra.mrb[2].mxu0 %vm478_vm4, %v1587_v60 }
  0x9e   : > { %1754 = vmatprep.mubr.msk.f32.mxu0 %vm2104_vm0, %v2105_v12  ;;  %v407_v63 = vpop.permute.xlu0 %406  ;;  %v410_v1 = vpop.permute.xlu1 %409 }
  0x9f   : > { %vm436_vm9 = vcmp.eq.s32.totalorder %v407_v63, %v2300_v52  ;;  %vm437_vm10 = vcmp.eq.s32.totalorder %v410_v1, %v2300_v52 }
  0xa0   : > { %v1590_v2 = vsel %vm436_vm9, 1.0, %v2105_v12  ;;  %v1591_v4 = vsel %vm437_vm10, 1.0, %v2105_v12 }
  0xa1   : > { %1755 = vmatmul.mubr.msk.f32.gmra.mrb[4].mxu0 %vm478_vm4, %v1588_v61 }
  0xa2   : > { %1757 = vmatprep.mubr.msk.f32.mxu0 %vm2104_vm0, %v2105_v12  ;;  %v413_v3 = vpop.permute.xlu0 %412  ;;  %v416_v5 = vpop.permute.xlu1 %415 }
  0xa3   : > { %vm438_vm11 = vcmp.eq.s32.totalorder %v413_v3, %v2300_v52  ;;  %vm439_vm12 = vcmp.eq.s32.totalorder %v416_v5, %v2300_v52 }
  0xa4   : > { %v1592_v6 = vsel %vm438_vm11, 1.0, %v2105_v12  ;;  %v1593_v8 = vsel %vm439_vm12, 1.0, %v2105_v12 }
  0xa5   : > { %1758 = vmatmul.mubr.msk.f32.gmra.mrb[6].mxu0 %vm478_vm4, %v1589_v0 }
  0xa6   : > { %1760 = vmatprep.mubr.msk.f32.mxu0 %vm2104_vm0, %v2105_v12  ;;  %v419_v7 = vpop.permute.xlu0 %418  ;;  %v422_v9 = vpop.permute.xlu1 %421 }
  0xa7   : > { %vm440_vm13 = vcmp.eq.s32.totalorder %v419_v7, %v2300_v52  ;;  %vm441_vm14 = vcmp.eq.s32.totalorder %v422_v9, %v2300_v52 }
  0xa8   : > { %v1594_v10 = vsel %vm440_vm13, 1.0, %v2105_v12  ;;  %v1595_v13 = vsel %vm441_vm14, 1.0, %v2105_v12 }
  0xa9   : > { %1761 = vmatmul.mubr.msk.f32.gmra.mrb[8].mxu0 %vm478_vm4, %v1590_v2 }
  0xaa   : > { %1763 = vmatprep.mubr.msk.f32.mxu0 %vm2104_vm0, %v2105_v12  ;;  %v425_v11 = vpop.permute.xlu0 %424  ;;  %v428_v14 = vpop.permute.xlu1 %427 }
  0xab   : > { %vm442_vm15 = vcmp.eq.s32.totalorder %v425_v11, %v2300_v52  ;;  %vm443_vm2 = vcmp.eq.s32.totalorder %v428_v14, %v2300_v52 }
  0xac   : > { %v1596_v15 = vsel %vm442_vm15, 1.0, %v2105_v12  ;;  %v1597_v17 = vsel %vm443_vm2, 1.0, %v2105_v12 }
  0xad   : > { %1764 = vmatmul.mubr.msk.f32.gmra.mrb[10].mxu0 %vm478_vm4, %v1591_v4 }
  0xae   : > { %1766 = vmatprep.mubr.msk.f32.mxu0 %vm2104_vm0, %v2105_v12  ;;  %v431_v16 = vpop.permute.xlu0 %430 }
  0xaf   : > { %vm444_vm3 = vcmp.eq.s32.totalorder %v431_v16, %v2300_v52 }
  0xb0   : > { %v1598_v18 = vsel %vm444_vm3, 1.0, %v2105_v12 }
  0xb1   : > { %1767 = vmatmul.mubr.msk.f32.gmra.mrb[12].mxu0 %vm478_vm4, %v1592_v6 }
  0xb2   : > { %1769 = vmatprep.mubr.msk.f32.mxu0 %vm2104_vm0, %v2105_v12 }
  0xb5   : > { %1770 = vmatmul.mubr.msk.f32.gmra.mrb[14].mxu0 %vm478_vm4, %v1593_v8 }
  0xb6   : > { %1772 = vmatprep.mubr.msk.f32.mxu0 %vm2104_vm0, %v2105_v12 }
  0xb9   : > { %1773 = vmatmul.mubr.msk.f32.gmra.mrb[16].mxu0 %vm478_vm4, %v1594_v10 }
  0xba   : > { %1775 = vmatprep.mubr.msk.f32.mxu0 %vm2104_vm0, %v2105_v12 }
  0xbd   : > { %1776 = vmatmul.mubr.msk.f32.gmra.mrb[18].mxu0 %vm478_vm4, %v1595_v13 }
  0xbe   : > { %1778 = vmatprep.mubr.msk.f32.mxu0 %vm2104_vm0, %v2105_v12 }
  0xc1   : > { %1779 = vmatmul.mubr.msk.f32.gmra.mrb[20].mxu0 %vm478_vm4, %v1596_v15 }
  0xc2   : > { %1781 = vmatprep.mubr.msk.f32.mxu0 %vm2104_vm0, %v2105_v12 }
  0xc5   : > { %1782 = vmatmul.mubr.msk.f32.gmra.mrb[22].mxu0 %vm478_vm4, %v1597_v17 }
  0xc6   : > { %1784 = vmatprep.mubr.msk.f32.mxu0 %vm2104_vm0, %v2105_v12 }
  0xc9   : > { %1785 = vmatmul.mubr.msk.f32.gmra.mrb[24].mxu0 %vm478_vm4, %v1598_v18  ;;  %vm929_vm4 = vcmask 130048  }
  0xca   : > { %1791 = vmatprep.mubr.msk.f32.mxu0 %vm2104_vm0, %v2105_v12 }
 0x103   : > { %v853_v19 = vpop.f32.mrb[0].mxu1 }
 0x104   : > { %v855_v20 = vpop.f32.mrb[1].mxu1 }
 0x105   : > { %v856_v21 = vpop.f32.mrb[2].mxu1 }
 0x106   : > { %v858_v22 = vpop.f32.mrb[3].mxu1 }
 0x10b   : > { %v861_v23 = vpop.f32.mrb[4].mxu1 }
 0x10c   : > { %v863_v24 = vpop.f32.mrb[5].mxu1 }
 0x10d   : > { %v864_v25 = vpop.f32.mrb[6].mxu1 }
 0x10e   : > { %v866_v26 = vpop.f32.mrb[7].mxu1 }
 0x113   : > { %v869_v27 = vpop.f32.mrb[8].mxu1 }
 0x114   : > { %v871_v28 = vpop.f32.mrb[9].mxu1 }
 0x115   : > { %v872_v29 = vpop.f32.mrb[10].mxu1 }
 0x116   : > { %v874_v30 = vpop.f32.mrb[11].mxu1 }
 0x11b   : > { %v877_v31 = vpop.f32.mrb[12].mxu1 }
 0x11c   : > { %v879_v32 = vpop.f32.mrb[13].mxu1 }
 0x11d   : > { %v880_v33 = vpop.f32.mrb[14].mxu1 }
 0x11e   : > { %v882_v35 = vpop.f32.mrb[15].mxu1 }
 0x123   : > { %v885_v36 = vpop.f32.mrb[16].mxu1 }
 0x124   : > { %v887_v37 = vpop.f32.mrb[17].mxu1 }
 0x125   : > { %v2377_v38 = vpop.f32.mrb[18].mxu1  ;;  %v2431_v37 = vld [vmem:[%s2607_s5] ss:$0 sm:$0xff] }
 0x126   : > { %v890_v39 = vpop.f32.mrb[19].mxu1 }
 0x12b   : > { %v2379_v40 = vpop.f32.mrb[20].mxu1 }
 0x12c   : > { %v895_v41 = vpop.f32.mrb[21].mxu1 }
 0x12d   : > { %v2381_v42 = vpop.f32.mrb[22].mxu1 }
 0x12e   : > { %v898_v43 = vpop.f32.mrb[23].mxu1 }
 0x133   : > { %v2383_v44 = vpop.f32.mrb[24].mxu1 }
 0x134   : > { %v903_v45 = vpop.f32.mrb[25].mxu1 }
 0x135   : > { %v904_v46 = vpop.f32.mrb[26].mxu1 }
 0x136   : > { %v905_v47 = vpop.f32.mrb[27].mxu1 }
 0x16c   : > { %v588_v48 = vpop.f32.mrb[0].mxu0 }
 0x16d   : > { %v854_v49 = vadd.f32 %v853_v19, %v588_v48  ;;  %v1750_v50 = vpop.f32.mrb[1].mxu0 }
 0x16f   : > { %v907_v51 = vmax.f32 %v854_v49, 0.0 }
 0x170   : > { %v593_v52 = vpop.f32.mrb[2].mxu0 }
 0x171   : > { %v857_v53 = vadd.f32 %v856_v21, %v593_v52  ;;  %v1753_v54 = vpop.f32.mrb[3].mxu0  ;;  %1792 = vmatmul.mubr.msk.f32.vlgmr.msra.gmra.mrb[26].mxu0 %vm929_vm4, %v907_v51 }
 0x172   : > { %1794 = vmatprep.mubr.msk.f32.mxu0 %vm2104_vm0, %v2105_v12  ;;  %1831 = vmatpush3.msra.mxu0 %v1112_v34 }
 0x173   : > { %v908_v55 = vmax.f32 %v857_v53, 0.0 }
 0x174   : > { %v598_v56 = vpop.f32.mrb[4].mxu0 }
 0x175   : > { %v862_v57 = vadd.f32 %v861_v23, %v598_v56  ;;  %v1756_v58 = vpop.f32.mrb[5].mxu0  ;;  %1795 = vmatmul.mubr.msk.f32.gmra.mrb[28].mxu0 %vm929_vm4, %v908_v55 }
 0x176   : > { %1797 = vmatprep.mubr.msk.f32.mxu0 %vm2104_vm0, %v2105_v12 }
 0x177   : > { %v909_v59 = vmax.f32 %v862_v57, 0.0 }
 0x178   : > { %v603_v60 = vpop.f32.mrb[6].mxu0 }
 0x179   : > { %v865_v61 = vadd.f32 %v864_v25, %v603_v60  ;;  %v1759_v62 = vpop.f32.mrb[7].mxu0  ;;  %1798 = vmatmul.mubr.msk.f32.gmra.mrb[30].mxu0 %vm929_vm4, %v909_v59 }
 0x17a   : > { %1800 = vmatprep.mubr.msk.f32.mxu0 %vm2104_vm0, %v2105_v12 }
 0x17b   : > { %v910_v63 = vmax.f32 %v865_v61, 0.0 }
 0x17c   : > { %v608_v0 = vpop.f32.mrb[8].mxu0 }
 0x17d   : > { %v870_v1 = vadd.f32 %v869_v27, %v608_v0  ;;  %v1762_v2 = vpop.f32.mrb[9].mxu0  ;;  %1801 = vmatmul.mubr.msk.f32.gmra.mrb[32].mxu0 %vm929_vm4, %v910_v63 }
 0x17e   : > { %1803 = vmatprep.mubr.msk.f32.mxu0 %vm2104_vm0, %v2105_v12 }
 0x17f   : > { %v911_v3 = vmax.f32 %v870_v1, 0.0 }
 0x180   : > { %v613_v4 = vpop.f32.mrb[10].mxu0 }
 0x181   : > { %v873_v5 = vadd.f32 %v872_v29, %v613_v4  ;;  %v1765_v6 = vpop.f32.mrb[11].mxu0  ;;  %1804 = vmatmul.mubr.msk.f32.gmra.mrb[34].mxu0 %vm929_vm4, %v911_v3 }
 0x182   : > { %1806 = vmatprep.mubr.msk.f32.mxu0 %vm2104_vm0, %v2105_v12 }
 0x183   : > { %v912_v7 = vmax.f32 %v873_v5, 0.0 }
 0x184   : > { %v618_v8 = vpop.f32.mrb[12].mxu0 }
 0x185   : > { %v878_v9 = vadd.f32 %v877_v31, %v618_v8  ;;  %v1768_v10 = vpop.f32.mrb[13].mxu0  ;;  %1807 = vmatmul.mubr.msk.f32.gmra.mrb[36].mxu0 %vm929_vm4, %v912_v7 }
 0x186   : > { %1809 = vmatprep.mubr.msk.f32.mxu0 %vm2104_vm0, %v2105_v12 }
 0x187   : > { %v913_v11 = vmax.f32 %v878_v9, 0.0 }
 0x188   : > { %v623_v13 = vpop.f32.mrb[14].mxu0 }
 0x189   : > { %v881_v14 = vadd.f32 %v880_v33, %v623_v13  ;;  %v1771_v15 = vpop.f32.mrb[15].mxu0  ;;  %1810 = vmatmul.mubr.msk.f32.gmra.mrb[38].mxu0 %vm929_vm4, %v913_v11 }
 0x18a   : > { %1812 = vmatprep.mubr.msk.f32.mxu0 %vm2104_vm0, %v2105_v12 }
 0x18b   : > { %v914_v16 = vmax.f32 %v881_v14, 0.0 }
 0x18c   : > { %v628_v17 = vpop.f32.mrb[16].mxu0 }
 0x18d   : > { %v886_v18 = vadd.f32 %v885_v36, %v628_v17  ;;  %v1774_v19 = vpop.f32.mrb[17].mxu0  ;;  %1813 = vmatmul.mubr.msk.f32.gmra.mrb[40].mxu0 %vm929_vm4, %v914_v16 }
 0x18e   : > { %1815 = vmatprep.mubr.msk.f32.mxu0 %vm2104_vm0, %v2105_v12 }
 0x18f   : > { %v915_v20 = vmax.f32 %v886_v18, 0.0 }
 0x190   : > { %v633_v21 = vpop.f32.mrb[18].mxu0 }
 0x191   : > { %v889_v22 = vadd.f32 %v2377_v38, %v633_v21  ;;  %v1777_v23 = vpop.f32.mrb[19].mxu0  ;;  %1816 = vmatmul.mubr.msk.f32.gmra.mrb[42].mxu0 %vm929_vm4, %v915_v20 }
 0x192   : > { %1818 = vmatprep.mubr.msk.f32.mxu0 %vm2104_vm0, %v2105_v12 }
 0x193   : > { %v916_v24 = vmax.f32 %v889_v22, 0.0 }
 0x194   : > { %v638_v25 = vpop.f32.mrb[20].mxu0 }
 0x195   : > { %v894_v26 = vadd.f32 %v2379_v40, %v638_v25  ;;  %v1780_v27 = vpop.f32.mrb[21].mxu0  ;;  %1819 = vmatmul.mubr.msk.f32.gmra.mrb[44].mxu0 %vm929_vm4, %v916_v24 }
 0x196   : > { %1821 = vmatprep.mubr.msk.f32.mxu0 %vm2104_vm0, %v2105_v12  ;;  %v1657_v27 = vld [vmem:[%s2609_s7] ss:$0 sm:$0xff] }
 0x197   : > { %v917_v28 = vmax.f32 %v894_v26, 0.0 }
 0x198   : > { %v643_v29 = vpop.f32.mrb[22].mxu0 }
 0x199   : > { %v897_v30 = vadd.f32 %v2381_v42, %v643_v29  ;;  %v1783_v31 = vpop.f32.mrb[23].mxu0  ;;  %1822 = vmatmul.mubr.msk.f32.gmra.mrb[46].mxu0 %vm929_vm4, %v917_v28 }
 0x19a   : > { %1824 = vmatprep.mubr.msk.f32.mxu0 %vm2104_vm0, %v2105_v12 }
 0x19b   : > { %v918_v32 = vmax.f32 %v897_v30, 0.0 }
 0x19c   : > { %v648_v33 = vpop.f32.mrb[24].mxu0 }
 0x19d   : > { %v902_v34 = vadd.f32 %v2383_v44, %v648_v33  ;;  %v1786_v35 = vpop.f32.mrb[25].mxu0  ;;  %1825 = vmatmul.mubr.msk.f32.gmra.mrb[48].mxu0 %vm929_vm4, %v918_v32 }
 0x19e   : > { %1827 = vmatprep.mubr.msk.f32.mxu0 %vm2104_vm0, %v2105_v12 }
 0x19f   : > { %v919_v36 = vmax.f32 %v902_v34, 0.0 }
 0x1a1   : > { %1828 = vmatmul.mubr.msk.f32.gmra.mrb[50].mxu0 %vm929_vm4, %v919_v36 }
 0x1a2   : > { %1832 = vmatprep.mubr.msk.f32.mxu0 %vm2104_vm0, %v2105_v12 }
 0x244   : > { %v1035_v38 = vpop.f32.mrb[26].mxu0 }
 0x245   : > { %v1036_v39 = vadd.f32 %v2431_v37, %v1035_v38  ;;  %v1793_v40 = vpop.f32.mrb[27].mxu0 }
 0x247   : > { %v1099_v41 = vmax.f32 %v1036_v39, 0.0 }
 0x248   : > { %v1040_v42 = vpop.f32.mrb[28].mxu0 }
 0x249   : > { %v1041_v43 = vadd.f32 %v2431_v37, %v1040_v42  ;;  %v1796_v44 = vpop.f32.mrb[29].mxu0  ;;  %1833 = vmatmul.mubr.msk.f32.vlgmr.msra.gmra.mrb[52].mxu0 %vm793_vm1, %v1099_v41 }
 0x24a   : > { %1835 = vmatprep.mubr.msk.f32.mxu0 %vm2104_vm0, %v2105_v12 }
 0x24b   : > { %v1100_v45 = vmax.f32 %v1041_v43, 0.0 }
 0x24c   : > { %v1045_v46 = vpop.f32.mrb[30].mxu0 }
 0x24d   : > { %v1046_v47 = vadd.f32 %v2431_v37, %v1045_v46  ;;  %v1799_v48 = vpop.f32.mrb[31].mxu0  ;;  %1836 = vmatmul.mubr.msk.f32.gmra.mrb[54].mxu0 %vm793_vm1, %v1100_v45 }
 0x24e   : > { %1838 = vmatprep.mubr.msk.f32.mxu0 %vm2104_vm0, %v2105_v12 }
 0x24f   : > { %v1101_v49 = vmax.f32 %v1046_v47, 0.0 }
 0x250   : > { %v1050_v50 = vpop.f32.mrb[32].mxu0 }
 0x251   : > { %v1051_v51 = vadd.f32 %v2431_v37, %v1050_v50  ;;  %v1802_v52 = vpop.f32.mrb[33].mxu0  ;;  %1839 = vmatmul.mubr.msk.f32.gmra.mrb[56].mxu0 %vm793_vm1, %v1101_v49 }
 0x253   : > { %v1102_v53 = vmax.f32 %v1051_v51, 0.0 }
 0x254   : > { %v1055_v54 = vpop.f32.mrb[34].mxu0 }
 0x255   : > { %v1056_v55 = vadd.f32 %v2431_v37, %v1055_v54  ;;  %v1805_v56 = vpop.f32.mrb[35].mxu0  ;;  %1842 = vmatmul.mubr.msk.f32.vlgmr.msra.gmra.mrb[28].mxu1 %vm793_vm1, %v1102_v53 }
 0x256   : > { %1844 = vmatprep.mubr.msk.f32.mxu1 %vm2104_vm0, %v2105_v12 }
 0x257   : > { %v1103_v57 = vmax.f32 %v1056_v55, 0.0 }
 0x258   : > { %v1060_v58 = vpop.f32.mrb[36].mxu0 }
 0x259   : > { %v1061_v59 = vadd.f32 %v2431_v37, %v1060_v58  ;;  %v1808_v60 = vpop.f32.mrb[37].mxu0  ;;  %1845 = vmatmul.mubr.msk.f32.gmra.mrb[30].mxu1 %vm793_vm1, %v1103_v57 }
 0x25a   : > { %1847 = vmatprep.mubr.msk.f32.mxu1 %vm2104_vm0, %v2105_v12 }
 0x25b   : > { %v1104_v61 = vmax.f32 %v1061_v59, 0.0 }
 0x25c   : > { %v1065_v62 = vpop.f32.mrb[38].mxu0 }
 0x25d   : > { %v1066_v63 = vadd.f32 %v2431_v37, %v1065_v62  ;;  %v1811_v0 = vpop.f32.mrb[39].mxu0  ;;  %1848 = vmatmul.mubr.msk.f32.gmra.mrb[32].mxu1 %vm793_vm1, %v1104_v61 }
 0x25e   : > { %1850 = vmatprep.mubr.msk.f32.mxu1 %vm2104_vm0, %v2105_v12 }
 0x25f   : > { %v1105_v1 = vmax.f32 %v1066_v63, 0.0 }
 0x260   : > { %v1070_v2 = vpop.f32.mrb[40].mxu0 }
 0x261   : > { %v1071_v3 = vadd.f32 %v2431_v37, %v1070_v2  ;;  %v1814_v4 = vpop.f32.mrb[41].mxu0  ;;  %1851 = vmatmul.mubr.msk.f32.gmra.mrb[34].mxu1 %vm793_vm1, %v1105_v1 }
 0x262   : > { %1853 = vmatprep.mubr.msk.f32.mxu1 %vm2104_vm0, %v2105_v12 }
 0x263   : > { %v1106_v5 = vmax.f32 %v1071_v3, 0.0 }
 0x264   : > { %v1075_v6 = vpop.f32.mrb[42].mxu0 }
 0x265   : > { %v1076_v7 = vadd.f32 %v2431_v37, %v1075_v6  ;;  %v1817_v8 = vpop.f32.mrb[43].mxu0  ;;  %1854 = vmatmul.mubr.msk.f32.gmra.mrb[36].mxu1 %vm793_vm1, %v1106_v5 }
 0x266   : > { %1856 = vmatprep.mubr.msk.f32.mxu1 %vm2104_vm0, %v2105_v12 }
 0x267   : > { %v1107_v9 = vmax.f32 %v1076_v7, 0.0 }
 0x268   : > { %v1080_v10 = vpop.f32.mrb[44].mxu0 }
 0x269   : > { %v1081_v11 = vadd.f32 %v2431_v37, %v1080_v10  ;;  %v1820_v13 = vpop.f32.mrb[45].mxu0  ;;  %1857 = vmatmul.mubr.msk.f32.gmra.mrb[38].mxu1 %vm793_vm1, %v1107_v9 }
 0x26a   : > { %1859 = vmatprep.mubr.msk.f32.mxu1 %vm2104_vm0, %v2105_v12 }
 0x26b   : > { %v1108_v14 = vmax.f32 %v1081_v11, 0.0 }
 0x26c   : > { %v1085_v15 = vpop.f32.mrb[46].mxu0 }
 0x26d   : > { %v1086_v16 = vadd.f32 %v2431_v37, %v1085_v15  ;;  %v1823_v17 = vpop.f32.mrb[47].mxu0  ;;  %1860 = vmatmul.mubr.msk.f32.gmra.mrb[40].mxu1 %vm793_vm1, %v1108_v14 }
 0x26e   : > { %1862 = vmatprep.mubr.msk.f32.mxu1 %vm2104_vm0, %v2105_v12 }
 0x26f   : > { %v1109_v18 = vmax.f32 %v1086_v16, 0.0 }
 0x270   : > { %v1090_v19 = vpop.f32.mrb[48].mxu0 }
 0x271   : > { %v1091_v20 = vadd.f32 %v2431_v37, %v1090_v19  ;;  %v1826_v21 = vpop.f32.mrb[49].mxu0  ;;  %1863 = vmatmul.mubr.msk.f32.gmra.mrb[42].mxu1 %vm793_vm1, %v1109_v18 }
 0x272   : > { %1865 = vmatprep.mubr.msk.f32.mxu1 %vm2104_vm0, %v2105_v12 }
 0x273   : > { %v1110_v22 = vmax.f32 %v1091_v20, 0.0 }
 0x274   : > { %v1095_v23 = vpop.f32.mrb[50].mxu0 }
 0x275   : > { %v1096_v24 = vadd.f32 %v2431_v37, %v1095_v23  ;;  %v1829_v25 = vpop.f32.mrb[51].mxu0  ;;  %1866 = vmatmul.mubr.msk.f32.gmra.mrb[44].mxu1 %vm793_vm1, %v1110_v22 }
 0x276   : > { %1868 = vmatprep.mubr.msk.f32.mxu1 %vm2104_vm0, %v2105_v12 }
 0x277   : > { %v1111_v26 = vmax.f32 %v1096_v24, 0.0 }
 0x279   : > { %1869 = vmatmul.mubr.msk.f32.gmra.mrb[46].mxu1 %vm793_vm1, %v1111_v26 }
 0x31c   : > { %v1225_v28 = vpop.f32.mrb[52].mxu0 }
 0x31d   : > { %v1226_v29 = vadd.f32 %v1657_v27, %v1225_v28  ;;  %v1834_v30 = vpop.f32.mrb[53].mxu0 }
 0x31f   : > { %1289 = vst.msk [vmem:[%s2485_s25] sm:$0xff] %vm929_vm4, %v1226_v29 }
 0x320   : > { %v1230_v12 = vpop.f32.mrb[54].mxu0 }
 0x321   : > { %v1231_v31 = vadd.f32 %v1657_v27, %v1230_v12  ;;  %v1837_v32 = vpop.f32.mrb[55].mxu0 }
 0x323   : > { %1290 = vst.msk [vmem:[%s2485_s25 + $0x8] sm:$0xff] %vm929_vm4, %v1231_v31 }
 0x324   : > { %v1235_v33 = vpop.f32.mrb[56].mxu0 }
 0x325   : > { %v1236_v34 = vadd.f32 %v1657_v27, %v1235_v33  ;;  %v1840_v35 = vpop.f32.mrb[57].mxu0 }
 0x327   : > { %1291 = vst.msk [vmem:[%s2485_s25 + $0x10] sm:$0xff] %vm929_vm4, %v1236_v34 }
 0x328   : > { %v1240_v36 = vpop.f32.mrb[28].mxu1 }
 0x329   : > { %v1241_v37 = vadd.f32 %v1657_v27, %v1240_v36  ;;  %v1843_v38 = vpop.f32.mrb[29].mxu1 }
 0x32b   : > { %1292 = vst.msk [vmem:[%s2485_s25 + $0x18] sm:$0xff] %vm929_vm4, %v1241_v37 }
 0x32c   : > { %v1245_v39 = vpop.f32.mrb[30].mxu1 }
 0x32d   : > { %v1246_v40 = vadd.f32 %v1657_v27, %v1245_v39  ;;  %v1846_v41 = vpop.f32.mrb[31].mxu1 }
 0x32f   : > { %1293 = vst.msk [vmem:[%s2485_s25 + $0x20] sm:$0xff] %vm929_vm4, %v1246_v40 }
 0x330   : > { %v1250_v42 = vpop.f32.mrb[32].mxu1 }
 0x331   : > { %v1251_v43 = vadd.f32 %v1657_v27, %v1250_v42  ;;  %v1849_v44 = vpop.f32.mrb[33].mxu1 }
 0x333   : > { %1294 = vst.msk [vmem:[%s2485_s25 + $0x28] sm:$0xff] %vm929_vm4, %v1251_v43 }
 0x334   : > { %v1255_v45 = vpop.f32.mrb[34].mxu1 }
 0x335   : > { %v1256_v46 = vadd.f32 %v1657_v27, %v1255_v45  ;;  %v1852_v47 = vpop.f32.mrb[35].mxu1 }
 0x337   : > { %1295 = vst.msk [vmem:[%s2485_s25 + $0x30] sm:$0xff] %vm929_vm4, %v1256_v46 }
 0x338   : > { %v1260_v48 = vpop.f32.mrb[36].mxu1 }
 0x339   : > { %v1261_v49 = vadd.f32 %v1657_v27, %v1260_v48  ;;  %v1855_v50 = vpop.f32.mrb[37].mxu1 }
 0x33b   : > { %1296 = vst.msk [vmem:[%s2485_s25 + $0x38] sm:$0xff] %vm929_vm4, %v1261_v49 }
 0x33c   : > { %v1265_v51 = vpop.f32.mrb[38].mxu1 }
 0x33d   : > { %v1266_v52 = vadd.f32 %v1657_v27, %v1265_v51  ;;  %v1858_v53 = vpop.f32.mrb[39].mxu1 }
 0x33f   : > { %1297 = vst.msk [vmem:[%s2485_s25 + $0x40] sm:$0xff] %vm929_vm4, %v1266_v52 }
 0x340   : > { %v1270_v54 = vpop.f32.mrb[40].mxu1 }
 0x341   : > { %v1271_v55 = vadd.f32 %v1657_v27, %v1270_v54  ;;  %v1861_v56 = vpop.f32.mrb[41].mxu1 }
 0x343   : > { %1298 = vst.msk [vmem:[%s2485_s25 + $0x48] sm:$0xff] %vm929_vm4, %v1271_v55 }
 0x344   : > { %v1275_v57 = vpop.f32.mrb[42].mxu1 }
 0x345   : > { %v1276_v58 = vadd.f32 %v1657_v27, %v1275_v57  ;;  %v1864_v59 = vpop.f32.mrb[43].mxu1 }
 0x347   : > { %1299 = vst.msk [vmem:[%s2485_s25 + $0x50] sm:$0xff] %vm929_vm4, %v1276_v58 }
 0x348   : > { %v1280_v60 = vpop.f32.mrb[44].mxu1 }
 0x349   : > { %v1281_v61 = vadd.f32 %v1657_v27, %v1280_v60  ;;  %v1867_v62 = vpop.f32.mrb[45].mxu1  ;;  %1308 = sbr.rel (!%p2176_p4) target bundleno = 909 (0x38d), region = 56 }
 0x34b   : > { %1300 = vst.msk [vmem:[%s2485_s25 + $0x58] sm:$0xff] %vm929_vm4, %v1281_v61 }
 0x34c   : > { %v1285_v63 = vpop.f32.mrb[46].mxu1 }
 0x34d   : > { %v1286_v0 = vadd.f32 %v1657_v27, %v1285_v63  ;;  %v1870_v1 = vpop.f32.mrb[47].mxu1 }
 0x34f   : > { %1301 = vst.msk [vmem:[%s2485_s25 + $0x60] sm:$0xff] %vm929_vm4, %v1286_v0 }
 0x350   : > { %s2619_s27 = smov (!%p1311_p8, %s1310_s27), 13 }
 0x351   : > { %s1671_s15 = sshll.u32 %s2619_s27, 7 }
 0x352   : > { %p1674_p9 = scmp.eq.s32.totalorder %s1671_s15, 0 }
 0x353   : > { %2010 = sdivrem.u32 (!%p1674_p9), %s2619_s27, 13 }
 0x354   : > { %1319 = sbr.rel (%p1674_p9) target bundleno = 909 (0x38d), region = 60 }
 0x35c   : > { %s2526_s13 = spop.drf %2010 }
 0x35d   : > { %p1675_p10 = scmp.le.s32.totalorder %s2526_s13, 0 }
 0x35e   : > { %s2612_s30 = smov (!%p1675_p10), %s2520_s11  ;;  %s2613_s14 = smov (!%p1675_p10), %s2485_s25 }
 0x35f   : > { %1529 = sbr.rel (%p1675_p10) target bundleno = 880 (0x370), region = 139  ;;  %s2535_s16 = smov (!%p1675_p10), 0  }
 0x360   : > { %s2537_s29 = smov (!%p1675_p10), 0  }
 0x366 LB: >> { %v1407_v2 = vld [vmem:[%s2076_s14] sm:$0xff]  ;;  %v1409_v3 = vld [vmem:[%s2076_s14 + $0x8] sm:$0xff]  ;;  %v1411_v4 = vld [vmem:[%s2076_s14 + $0x10] sm:$0xff]  ;;  %s1433_s20 = sadd.s32 1, %s2080_s16  ;;  %s1401_s29 = sadd.s32 1, %s2084_s29   ;;  %s2084_s29 = sphi %s2537_s29, %s1401_s29   ;;  %s2080_s16 = sphi %s2535_s16, %s2614_s16   ;;  %s2076_s14 = sphi %s2613_s14, %s1438_s14   ;;  %s2072_s30 = sphi %s2612_s30, %s1439_s30  }
 0x367   : >> { %1408 = vst [vmem:[%s2072_s30] sm:$0xff] %v1407_v2  ;;  %1410 = vst [vmem:[%s2072_s30 + $0x8] sm:$0xff] %v1409_v3  ;;  %v1413_v5 = vld [vmem:[%s2076_s14 + $0x18] sm:$0xff]  ;;  %v1415_v6 = vld [vmem:[%s2076_s14 + $0x20] sm:$0xff]  ;;  %p1434_p11 = scmp.ge.s32.totalorder %s1433_s20, %s2526_s13  ;;  %p1400_p12 = scmp.ge.s32.totalorder %s1401_s29, %s2526_s13 }
 0x368   : >> { %1412 = vst [vmem:[%s2072_s30 + $0x10] sm:$0xff] %v1411_v4  ;;  %v1417_v7 = vld [vmem:[%s2076_s14 + $0x28] sm:$0xff]  ;;  %1414 = vst [vmem:[%s2072_s30 + $0x18] sm:$0xff] %v1413_v5  ;;  %v1419_v8 = vld [vmem:[%s2076_s14 + $0x30] sm:$0xff] }
 0x369   : >> { %1416 = vst [vmem:[%s2072_s30 + $0x20] sm:$0xff] %v1415_v6  ;;  %1418 = vst [vmem:[%s2072_s30 + $0x28] sm:$0xff] %v1417_v7  ;;  %v1421_v9 = vld [vmem:[%s2076_s14 + $0x38] sm:$0xff]  ;;  %v1423_v10 = vld [vmem:[%s2076_s14 + $0x40] sm:$0xff]  ;;  %s2621_s20 = smov (%p1434_p11, %s1433_s20), 0  ;;  %1403 = sbr.rel (!%p1400_p12) target bundleno = 870 (0x366), region = 145 }
 0x36a   : >> { %1420 = vst [vmem:[%s2072_s30 + $0x30] sm:$0xff] %v1419_v8  ;;  %1422 = vst [vmem:[%s2072_s30 + $0x38] sm:$0xff] %v1421_v9  ;;  %v1425_v11 = vld [vmem:[%s2076_s14 + $0x48] sm:$0xff]  ;;  %v1427_v13 = vld [vmem:[%s2076_s14 + $0x50] sm:$0xff]  ;;  %s1436_s17 = smul.u32 104, %s2621_s20  ;;  %s2614_s16 = smov %s2621_s20 }
 0x36b   : >> { %1424 = vst [vmem:[%s2072_s30 + $0x40] sm:$0xff] %v1423_v10  ;;  %v1429_v14 = vld [vmem:[%s2076_s14 + $0x58] sm:$0xff]  ;;  %1426 = vst [vmem:[%s2072_s30 + $0x48] sm:$0xff] %v1425_v11  ;;  %v1431_v15 = vld [vmem:[%s2076_s14 + $0x60] sm:$0xff] }
 0x36c   : >> { %1428 = vst [vmem:[%s2072_s30 + $0x50] sm:$0xff] %v1427_v13  ;;  %1430 = vst [vmem:[%s2072_s30 + $0x58] sm:$0xff] %v1429_v14  ;;  %s1438_s14 = scalar_lea.vmem %s2485_s25, %s1436_s17 [#allocation2]  }
 0x36d   : >> { %1432 = vst [vmem:[%s2072_s30 + $0x60] sm:$0xff] %v1431_v15  ;;  %s1439_s30 = scalar_lea.vmem %s2520_s11, %s1436_s17  }
 0x370 PF: > { %2012 = sdivrem.u32 %s2619_s27, 13 }
 0x371   : > { %s1676_s18 = smul.u32 104, %s2526_s13 }
 0x373   : > { %s1444_s19 = scalar_lea.vmem %s2485_s25, %s1676_s18 [#allocation2]   ;;  %s1446_s21 = scalar_lea.vmem %s2520_s11, %s1676_s18  }
 0x379   : > { %s2013_s22 = spop.drf %2012 }
 0x37a   : > { %p1678_p13 = scmp.le.s32.totalorder %s2013_s22, 0 }
 0x37b   : > { %s2086_s24 = smov (!%p1678_p13), %s1446_s21   ;;  %s2090_s26 = smov (!%p1678_p13), %s1444_s19  }
 0x37c   : > { %1543 = sbr.rel (%p1678_p13) target bundleno = 909 (0x38d), region = 150  ;;  %s2094_s10 = smov (!%p1678_p13), 0  }
 0x37d   : > { %s2098_s23 = smov (!%p1678_p13), 0  }
 0x383 LB: >> { %v1456_v16 = vld [vmem:[%s2092_s26] sm:$0xff]  ;;  %s1458_s15 = sadd.s32 1, %s2096_s10  ;;  %s1450_s23 = sadd.s32 1, %s2100_s23   ;;  %s2100_s23 = sphi %s2098_s23, %s1450_s23   ;;  %s2096_s10 = sphi %s2094_s10, %s2095_s10   ;;  %s2092_s26 = sphi %s2090_s26, %s1463_s26   ;;  %s2088_s24 = sphi %s2086_s24, %s1464_s24  }
 0x384   : >> { %1457 = vst [vmem:[%s2088_s24] sm:$0xff] %v1456_v16  ;;  %p1459_p0 = scmp.ge.s32.totalorder %s1458_s15, %s2013_s22  ;;  %p1449_p1 = scmp.ge.s32.totalorder %s1450_s23, %s2013_s22 }
 0x386   : >> { %s2623_s15 = smov (%p1459_p0, %s1458_s15), 0  ;;  %1452 = sbr.rel (!%p1449_p1) target bundleno = 899 (0x383), region = 156 }
 0x387   : >> { %s1679_s25 = sshll.u32 %s2623_s15, 3  ;;  %s2095_s10 = smov %s2623_s15  }
 0x388   : >> { %s1463_s26 = scalar_lea.vmem %s1444_s19, %s1679_s25 [#allocation2]   ;;  %s1464_s24 = scalar_lea.vmem %s1446_s21, %s1679_s25  }
 0x38d PF: > { %p15_p2 = scmp.ge.s32.totalorder %s2166_s9, 4   ;;  %s2615_s27 = smov %s2064_s28 }
 0x38e   : > { %s2616_s28 = smov %s2174_s12  ;;  %s2617_s29 = smov %s2166_s9 }
 0x38f   :  { %17 = sbr.rel (!%p15_p2) target bundleno = 2 (0x2), region = 167 }

</bundles_post_ra>
